<compile_context>
chip_gen: v6e
topology: v6e:2x2x1
jax: 0.10.0
libtpu: 0.0.40
codegen_flags: <defaults>
</compile_context>

<pallas_src>
import jax
import jax.numpy as jnp
from jax.experimental import pallas as pl
from jax.experimental.pallas import tpu as pltpu


def _cdiv(a, b):
    return -(-a // b)


def _lc_attention_kernel(x_ref, wkv_ref, wq_ref, segk_ref, segv_ref,
                         wout_ref, bout_ref, o_ref):
    """One grid step = Bb batch elements, fully resident in VMEM.

    x_ref    : (Bb, N, DIM)        input dtype
    wkv_ref  : (DIM, 2*inner)      bf16  packed [W_k | W_v]
    wq_ref   : (DIM, 2*inner)      bf16  [W_q * scale | 0]
    segk_ref : (2*inner, heads)    bf16  k-column -> head indicator (v rows 0)
    segv_ref : (heads, 2*inner)    bf16  head -> v-column indicator (k cols 0)
    wout_ref : (2*inner, DIM)      bf16  [0 ; W_out]
    bout_ref : (1, DIM)            f32
    o_ref    : (Bb, DIM)           out dtype
    """
    bb, n, dim = x_ref.shape
    two_inner = wkv_ref.shape[1]
    heads = segk_ref.shape[1]

    x = x_ref[...].astype(jnp.bfloat16)                                  # (Bb, N, DIM)

    # Fused K|V projection over all Bb*N tokens: one full-width MXU pass.
    kv = jnp.dot(x.reshape(bb * n, dim), wkv_ref[...],
                 preferred_element_type=jnp.float32)                     # (Bb*N, 2I)

    # Q projection only for the last token of each batch row (the only query
    # LCAttention uses); softmax scale is pre-folded into the weight.
    q = jnp.dot(x[:, n - 1, :], wq_ref[...],
                preferred_element_type=jnp.float32)                      # (Bb, 2I), v-half 0

    # Per-head scores: scores[b, j, h] = sum_{c in head h} q[b, c] * k[b, j, c]
    kv3 = kv.reshape(bb, n, two_inner)
    kq = (kv3 * q[:, None, :]).astype(jnp.bfloat16)                      # (Bb, N, 2I)
    scores = jnp.dot(kq.reshape(bb * n, two_inner), segk_ref[...],
                     preferred_element_type=jnp.float32)                 # (Bb*N, H)
    scores = scores.reshape(bb, n, heads)

    # Softmax over the key axis (axis=1), per batch row / head. f32 VPU + EUP.
    m = jnp.max(scores, axis=1, keepdims=True)                           # (Bb, 1, H)
    e = jnp.exp(scores - m)                                              # (Bb, N, H)
    s = jnp.sum(e, axis=1, keepdims=True)                                # (Bb, 1, H)
    attn = e * pl.reciprocal(s, approx=True)                             # (Bb, N, H)

    # attn @ V without transposes: broadcast attn onto the packed v-columns
    # (zeros on the k-columns), then multiply-and-reduce over the key axis.
    attn_bc = jnp.dot(attn.reshape(bb * n, heads).astype(jnp.bfloat16),
                      segv_ref[...],
                      preferred_element_type=jnp.float32)                # (Bb*N, 2I)
    ctx = jnp.sum((attn_bc * kv).reshape(bb, n, two_inner), axis=1)      # (Bb, 2I)

    # Output projection (+ bias); k-rows of the padded W_out are zero.
    y = jnp.dot(ctx.astype(jnp.bfloat16), wout_ref[...],
                preferred_element_type=jnp.float32) + bout_ref[...]      # (Bb, DIM)
    o_ref[...] = y.astype(o_ref.dtype)
    # TODO(synk): Dropout with p > 0 not implemented; module default p=0.0 is identity.


def prepare_lc_attention_params(params, *, heads, dim_head):
    """One-time parameter prep: fuse / pad / cast weights and build the
    head-segment indicator matrices so the kernel does zero layout work."""
    w_qkv = params["w_qkv"]                       # (DIM, 3*inner), columns [q | k | v]
    w_out = params["w_out"]                       # (inner, DIM)
    b_out = params["b_out"]                       # (DIM,)
    dim = w_qkv.shape[0]
    inner = heads * dim_head
    scale = dim_head ** -0.5

    w_q = w_qkv[:, :inner] * scale                # fold softmax scale (free at run time)
    w_k = w_qkv[:, inner:2 * inner]
    w_v = w_qkv[:, 2 * inner:]

    one_hot = (jnp.arange(inner)[:, None] // dim_head
               == jnp.arange(heads)[None, :]).astype(jnp.bfloat16)       # (inner, heads)
    zeros_oh = jnp.zeros_like(one_hot)

    return dict(
        w_kv=jnp.concatenate([w_k, w_v], axis=1).astype(jnp.bfloat16),   # (DIM, 2I)
        w_q=jnp.concatenate([w_q, jnp.zeros_like(w_q)],
                            axis=1).astype(jnp.bfloat16),                # (DIM, 2I)
        seg_k=jnp.concatenate([one_hot, zeros_oh], axis=0),              # (2I, H) bf16
        seg_v=jnp.concatenate([zeros_oh, one_hot], axis=0).T,            # (H, 2I) bf16
        w_out=jnp.concatenate([jnp.zeros_like(w_out), w_out],
                              axis=0).astype(jnp.bfloat16),              # (2I, DIM)
        b_out=b_out.reshape(1, dim).astype(jnp.float32),                 # (1, DIM)
    )


def lc_attention_pallas(x, prep, *, block_b=None):
    B, N, DIM = x.shape

    if block_b is None:
        block_b = max(1, 512 // max(N, 1))            # target ~512 flattened rows / step
        if B > 1:
            block_b = min(block_b, _cdiv(B, 2))       # keep >=2 grid steps (v7x: 2 TCs)
        block_b = min(block_b, B)
        if block_b != B and block_b % 8 != 0:
            block_b = min(B, _cdiv(block_b, 8) * 8)   # sublane-aligned output block

    num_blocks = _cdiv(B, block_b)
    b_pad = num_blocks * block_b
    if b_pad != B:
        x = jnp.pad(x, ((0, b_pad - B), (0, 0), (0, 0)))

    out2d = pl.pallas_call(
        _lc_attention_kernel,
        out_shape=jax.ShapeDtypeStruct((b_pad, DIM), x.dtype),
        grid=(num_blocks,),
        in_specs=[
            pl.BlockSpec((block_b, N, DIM), lambda b: (b, 0, 0)),   # x
            pl.BlockSpec(prep["w_kv"].shape, lambda b: (0, 0)),     # [W_k | W_v]
            pl.BlockSpec(prep["w_q"].shape, lambda b: (0, 0)),      # [W_q*scale | 0]
            pl.BlockSpec(prep["seg_k"].shape, lambda b: (0, 0)),    # k-col -> head
            pl.BlockSpec(prep["seg_v"].shape, lambda b: (0, 0)),    # head -> v-col
            pl.BlockSpec(prep["w_out"].shape, lambda b: (0, 0)),    # [0 ; W_out]
            pl.BlockSpec(prep["b_out"].shape, lambda b: (0, 0)),    # bias
        ],
        out_specs=pl.BlockSpec((block_b, DIM), lambda b: (b, 0)),
        compiler_params=pltpu.CompilerParams(
            dimension_semantics=("parallel",)),
    )(x, prep["w_kv"], prep["w_q"], prep["seg_k"], prep["seg_v"],
      prep["w_out"], prep["b_out"])

    return out2d[:B].reshape(B, 1, DIM)


def lc_attention_reference(x, params, *, heads, dim_head):
    """Pure-JAX mirror of the PyTorch LCAttention.forward (all f32)."""
    B, N, DIM = x.shape
    inner = heads * dim_head
    qkv = x @ params["w_qkv"]
    q, k, v = jnp.split(qkv, 3, axis=-1)
    to_h = lambda t: t.reshape(B, N, heads, dim_head).transpose(0, 2, 1, 3)
    q, k, v = map(to_h, (q, k, v))
    q = q[:, :, -1:, :]                                      # only last token queries
    dots = jnp.einsum('bhid,bhjd->bhij', q, k) * (dim_head ** -0.5)
    attn = jax.nn.softmax(dots, axis=-1)
    out = jnp.einsum('bhij,bhjd->bhid', attn, v)
    out = out.transpose(0, 2, 1, 3).reshape(B, 1, inner)
    return out @ params["w_out"] + params["b_out"]


if __name__ == "__main__":
    # Small, module-consistent shapes (grid ends up with 2 parallel steps).
    B, N, DIM = 16, 8, 32
    HEADS, DIM_HEAD = 4, 16
    INNER = HEADS * DIM_HEAD

    key = jax.random.PRNGKey(0)
    k1, k2, k3, k4 = jax.random.split(key, 4)

    params = {
        # nn.Linear(dim, inner*3, bias=False) weight, stored (in, out)
        "w_qkv": jax.random.normal(k1, (DIM, 3 * INNER), jnp.float32) * 0.05,
        # nn.Linear(inner, dim) weight (in, out) + bias
        "w_out": jax.random.normal(k2, (INNER, DIM), jnp.float32) * 0.05,
        "b_out": jax.random.normal(k3, (DIM,), jnp.float32) * 0.01,
    }
    x = jax.random.normal(k4, (B, N, DIM), jnp.float32)

    prep = prepare_lc_attention_params(params, heads=HEADS, dim_head=DIM_HEAD)
    out = lc_attention_pallas(x, prep)
    out = jax.block_until_ready(out)

    ref = lc_attention_reference(x, params, heads=HEADS, dim_head=DIM_HEAD)
    assert out.shape == (B, 1, DIM), out.shape
    max_err = jnp.max(jnp.abs(out - ref))
    # bf16 MXU feeds + approx reciprocal => relaxed tolerance vs pure-f32 reference.
    assert jnp.allclose(out, ref, atol=3e-2, rtol=3e-2), f"max abs err = {max_err}"
    print("KERNEL_OK")
</pallas_src>

<mosaic_0001>
module attributes {stable_mosaic.version = 11 : i64} {
  func.func @_lc_attention_kernel(%arg0: i32, %arg1: memref<8x8x32xf32, #tpu.memory_space<vmem>>, %arg2: memref<32x128xbf16, #tpu.memory_space<vmem>>, %arg3: memref<32x128xbf16, #tpu.memory_space<vmem>>, %arg4: memref<128x4xbf16, #tpu.memory_space<vmem>>, %arg5: memref<4x128xbf16, #tpu.memory_space<vmem>>, %arg6: memref<128x32xbf16, #tpu.memory_space<vmem>>, %arg7: memref<1x32xf32, #tpu.memory_space<vmem>>, %arg8: memref<8x32xf32, #tpu.memory_space<vmem>>) attributes {dimension_semantics = [#tpu.dimension_semantics<parallel>], iteration_bounds = array<i64: 2>, scalar_prefetch = 0 : i64, scratch_operands = 0 : i64, tpu.core_type = #tpu.core_type<tc>, window_params = [{transform_indices = @transform_0, window_bounds = array<i64: 8, 8, 32>}, {pipeline_mode = #tpu.pipeline_mode<synchronous>, transform_indices = @transform_1, window_bounds = array<i64: 32, 128>}, {pipeline_mode = #tpu.pipeline_mode<synchronous>, transform_indices = @transform_2, window_bounds = array<i64: 32, 128>}, {pipeline_mode = #tpu.pipeline_mode<synchronous>, transform_indices = @transform_3, window_bounds = array<i64: 128, 4>}, {pipeline_mode = #tpu.pipeline_mode<synchronous>, transform_indices = @transform_4, window_bounds = array<i64: 4, 128>}, {pipeline_mode = #tpu.pipeline_mode<synchronous>, transform_indices = @transform_5, window_bounds = array<i64: 128, 32>}, {pipeline_mode = #tpu.pipeline_mode<synchronous>, transform_indices = @transform_6, window_bounds = array<i64: 1, 32>}, {transform_indices = @transform_7, window_bounds = array<i64: 8, 32>}]} {
    %c0 = arith.constant 0 : index
    %c0_0 = arith.constant 0 : index
    %c0_1 = arith.constant 0 : index
    %0 = vector.load %arg1[%c0, %c0_0, %c0_1] : memref<8x8x32xf32, #tpu.memory_space<vmem>>, vector<8x8x32xf32>
    %1 = arith.truncf %0 : vector<8x8x32xf32> to vector<8x8x32xbf16>
    %2 = vector.shape_cast %1 : vector<8x8x32xbf16> to vector<64x32xbf16>
    %c0_2 = arith.constant 0 : index
    %c0_3 = arith.constant 0 : index
    %3 = vector.load %arg2[%c0_2, %c0_3] : memref<32x128xbf16, #tpu.memory_space<vmem>>, vector<32x128xbf16>
    %cst = arith.constant dense<0.000000e+00> : vector<64x128xf32>
    %4 = tpu.matmul %2, %3, %cst {dimension_numbers = #tpu.dot_dimension_numbers<[1], [0], [0], [1], [0, 0, 1, 1], [], []>} : vector<64x32xbf16>, vector<32x128xbf16>, vector<64x128xf32> -> vector<64x128xf32>
    %5 = vector.extract_strided_slice %1 {offsets = [0, 7, 0], sizes = [8, 1, 32], strides = [1, 1, 1]} : vector<8x8x32xbf16> to vector<8x1x32xbf16>
    %6 = vector.shape_cast %5 : vector<8x1x32xbf16> to vector<8x32xbf16>
    %c0_4 = arith.constant 0 : index
    %c0_5 = arith.constant 0 : index
    %7 = vector.load %arg3[%c0_4, %c0_5] : memref<32x128xbf16, #tpu.memory_space<vmem>>, vector<32x128xbf16>
    %cst_6 = arith.constant dense<0.000000e+00> : vector<8x128xf32>
    %8 = tpu.matmul %6, %7, %cst_6 {dimension_numbers = #tpu.dot_dimension_numbers<[1], [0], [0], [1], [0, 0, 1, 1], [], []>} : vector<8x32xbf16>, vector<32x128xbf16>, vector<8x128xf32> -> vector<8x128xf32>
    %9 = vector.shape_cast %4 : vector<64x128xf32> to vector<8x8x128xf32>
    %10 = vector.shape_cast %8 : vector<8x128xf32> to vector<8x1x128xf32>
    %11 = vector.broadcast %10 : vector<8x1x128xf32> to vector<8x8x128xf32>
    %12 = arith.mulf %9, %11 : vector<8x8x128xf32>
    %13 = arith.truncf %12 : vector<8x8x128xf32> to vector<8x8x128xbf16>
    %14 = vector.shape_cast %13 : vector<8x8x128xbf16> to vector<64x128xbf16>
    %c0_7 = arith.constant 0 : index
    %c0_8 = arith.constant 0 : index
    %15 = vector.load %arg4[%c0_7, %c0_8] : memref<128x4xbf16, #tpu.memory_space<vmem>>, vector<128x4xbf16>
    %cst_9 = arith.constant dense<0.000000e+00> : vector<64x4xf32>
    %16 = tpu.matmul %14, %15, %cst_9 {dimension_numbers = #tpu.dot_dimension_numbers<[1], [0], [0], [1], [0, 0, 1, 1], [], []>} : vector<64x128xbf16>, vector<128x4xbf16>, vector<64x4xf32> -> vector<64x4xf32>
    %17 = vector.shape_cast %16 : vector<64x4xf32> to vector<8x8x4xf32>
    %cst_10 = arith.constant dense<0xFF800000> : vector<8x4xf32>
    %18 = vector.multi_reduction <maximumf>, %17, %cst_10 [1] : vector<8x8x4xf32> to vector<8x4xf32>
    %19 = vector.shape_cast %18 : vector<8x4xf32> to vector<8x1x4xf32>
    %20 = vector.broadcast %19 : vector<8x1x4xf32> to vector<8x8x4xf32>
    %21 = arith.subf %17, %20 : vector<8x8x4xf32>
    %22 = math.exp %21 : vector<8x8x4xf32>
    %cst_11 = arith.constant dense<0.000000e+00> : vector<8x4xf32>
    %23 = vector.multi_reduction <add>, %22, %cst_11 [1] : vector<8x8x4xf32> to vector<8x4xf32>
    %24 = vector.shape_cast %23 : vector<8x4xf32> to vector<8x1x4xf32>
    %25 = tpu.reciprocal %24 {approx = true} : vector<8x1x4xf32> -> vector<8x1x4xf32>
    %26 = vector.broadcast %25 : vector<8x1x4xf32> to vector<8x8x4xf32>
    %27 = arith.mulf %22, %26 : vector<8x8x4xf32>
    %28 = vector.shape_cast %27 : vector<8x8x4xf32> to vector<64x4xf32>
    %29 = arith.truncf %28 : vector<64x4xf32> to vector<64x4xbf16>
    %c0_12 = arith.constant 0 : index
    %c0_13 = arith.constant 0 : index
    %30 = vector.load %arg5[%c0_12, %c0_13] : memref<4x128xbf16, #tpu.memory_space<vmem>>, vector<4x128xbf16>
    %cst_14 = arith.constant dense<0.000000e+00> : vector<64x128xf32>
    %31 = tpu.matmul %29, %30, %cst_14 {dimension_numbers = #tpu.dot_dimension_numbers<[1], [0], [0], [1], [0, 0, 1, 1], [], []>} : vector<64x4xbf16>, vector<4x128xbf16>, vector<64x128xf32> -> vector<64x128xf32>
    %32 = arith.mulf %31, %4 : vector<64x128xf32>
    %33 = vector.shape_cast %32 : vector<64x128xf32> to vector<8x8x128xf32>
    %cst_15 = arith.constant dense<0.000000e+00> : vector<8x128xf32>
    %34 = vector.multi_reduction <add>, %33, %cst_15 [1] : vector<8x8x128xf32> to vector<8x128xf32>
    %35 = arith.truncf %34 : vector<8x128xf32> to vector<8x128xbf16>
    %c0_16 = arith.constant 0 : index
    %c0_17 = arith.constant 0 : index
    %36 = vector.load %arg6[%c0_16, %c0_17] : memref<128x32xbf16, #tpu.memory_space<vmem>>, vector<128x32xbf16>
    %cst_18 = arith.constant dense<0.000000e+00> : vector<8x32xf32>
    %37 = tpu.matmul %35, %36, %cst_18 {dimension_numbers = #tpu.dot_dimension_numbers<[1], [0], [0], [1], [0, 0, 1, 1], [], []>} : vector<8x128xbf16>, vector<128x32xbf16>, vector<8x32xf32> -> vector<8x32xf32>
    %c0_19 = arith.constant 0 : index
    %c0_20 = arith.constant 0 : index
    %38 = vector.load %arg7[%c0_19, %c0_20] : memref<1x32xf32, #tpu.memory_space<vmem>>, vector<1x32xf32>
    %39 = vector.broadcast %38 : vector<1x32xf32> to vector<8x32xf32>
    %40 = arith.addf %37, %39 : vector<8x32xf32>
    %c0_21 = arith.constant 0 : index
    %c0_22 = arith.constant 0 : index
    %41 = vector.load %arg8[%c0_21, %c0_22] : memref<8x32xf32, #tpu.memory_space<vmem>>, vector<8x32xf32>
    tpu.vector_store %arg8[%c0_21, %c0_22], %40 {strides = array<i32>} : memref<8x32xf32, #tpu.memory_space<vmem>>, vector<8x32xf32>,
    return
  }
  func.func @transform_0(%arg0: i32) -> (i32, i32, i32) {
    %c0_i32 = arith.constant 0 : i32
    %c0_i32_0 = arith.constant 0 : i32
    %c0_i32_1 = arith.constant 0 : i32
    return %arg0, %c0_i32, %c0_i32_0 : i32, i32, i32
  }
  func.func @transform_1(%arg0: i32) -> (i32, i32) {
    %c0_i32 = arith.constant 0 : i32
    %c0_i32_0 = arith.constant 0 : i32
    %c0_i32_1 = arith.constant 0 : i32
    return %c0_i32, %c0_i32_0 : i32, i32
  }
  func.func @transform_2(%arg0: i32) -> (i32, i32) {
    %c0_i32 = arith.constant 0 : i32
    %c0_i32_0 = arith.constant 0 : i32
    %c0_i32_1 = arith.constant 0 : i32
    return %c0_i32, %c0_i32_0 : i32, i32
  }
  func.func @transform_3(%arg0: i32) -> (i32, i32) {
    %c0_i32 = arith.constant 0 : i32
    %c0_i32_0 = arith.constant 0 : i32
    %c0_i32_1 = arith.constant 0 : i32
    return %c0_i32, %c0_i32_0 : i32, i32
  }
  func.func @transform_4(%arg0: i32) -> (i32, i32) {
    %c0_i32 = arith.constant 0 : i32
    %c0_i32_0 = arith.constant 0 : i32
    %c0_i32_1 = arith.constant 0 : i32
    return %c0_i32, %c0_i32_0 : i32, i32
  }
  func.func @transform_5(%arg0: i32) -> (i32, i32) {
    %c0_i32 = arith.constant 0 : i32
    %c0_i32_0 = arith.constant 0 : i32
    %c0_i32_1 = arith.constant 0 : i32
    return %c0_i32, %c0_i32_0 : i32, i32
  }
  func.func @transform_6(%arg0: i32) -> (i32, i32) {
    %c0_i32 = arith.constant 0 : i32
    %c0_i32_0 = arith.constant 0 : i32
    %c0_i32_1 = arith.constant 0 : i32
    return %c0_i32, %c0_i32_0 : i32, i32
  }
  func.func @transform_7(%arg0: i32) -> (i32, i32) {
    %c0_i32 = arith.constant 0 : i32
    %c0_i32_0 = arith.constant 0 : i32
    return %arg0, %c0_i32 : i32, i32
  }
}

</mosaic_0001>

<bundles_post_ra>
// kernel: tpu_custom_call.1
= control target key start
LH: loop header
LB: loop body
LE: loop exit
PB: predicated region body
PF: predicated region fallthrough
CT: control target
= control target key end

     0   :  { %12 = vsyncpa [#allocation3], 0  ;;  %s2086_s0 = inlined_call_operand.vmem [shape: f32[16,8,32], index: 0, kind: input, shape index: {}]   ;;  %s2087_s1 = inlined_call_operand.hbm [shape: bf16[32,128], index: 1, kind: input, shape index: {}]   ;;  %s2088_s2 = inlined_call_operand.hbm [shape: bf16[32,128], index: 2, kind: input, shape index: {}]   ;;  %s2089_s3 = inlined_call_operand.vmem [shape: bf16[128,4], index: 3, kind: input, shape index: {}]   ;;  %s2090_s4 = inlined_call_operand.vmem [shape: bf16[4,128], index: 4, kind: input, shape index: {}]   ;;  %s2091_s5 = inlined_call_operand.vmem [shape: bf16[128,32], index: 5, kind: input, shape index: {}]   ;;  %s2092_s6 = inlined_call_operand.vmem [shape: f32[1,32], index: 6, kind: input, shape index: {}]   ;;  %s2093_s7 = inlined_call_operand.hbm [shape: f32[16,32], index: 7, kind: output, shape index: {}]  }
   0x1   :  { %13 = vsyncpa [#allocation6], 0 }
   0x2   :  { %14 = vsyncpa [#allocation4], 0 }
   0x3   :  { %16 = vsyncpa [#allocation4 + $0x1], 0  ;;  %s1773_s24 = smov 0   ;;  %s1775_s25 = smov 0  }
   0x4   :  { %s1777_s26 = smov 0   ;;  %s1779_s27 = smov 0  }
   0x5 LB: > { %s1794_s28 = sadd.s32 4294967295, %s1723_s27   ;;  %s1315_s29 = sadd.s32 4294967294, %s1723_s27   ;;  %s1723_s27 = sphi %s1779_s27, %s2107_s27   ;;  %s1719_s26 = sphi %s1777_s26, %s2106_s26   ;;  %s1715_s25 = sphi %s1775_s25, %s2105_s25   ;;  %s1711_s24 = sphi %s1773_s24, %s2104_s24  }
   0x6   : > { %s1798_s30 = sadd.s32 1, %s1723_s27   ;;  %s181_s8 = sadd.s32 1, %s1719_s26 }
   0x7   : > { %s178_s9 = ssub.s32 %s1723_s27, %s1798_s30  ;;  %p191_p0 = scmp.ne.s32.totalorder %s1719_s26, %s1715_s25 }
   0x8   : > { %p179_p1 = scmp.eq.s32.totalorder %s178_s9, 0  ;;  %p192_p2 = scmp.eq.s32.totalorder %s1794_s28, 1 }
   0x9   : > { %p197_p3 = scmp.ne.s32.totalorder %s1715_s25, %s1711_s24  ;;  %p198_p4 = scmp.eq.s32.totalorder %s1315_s29, 1 }
   0xa   : > { %s1809_s10 = scalar_select %p179_p1, %s1719_s26, %s181_s8  }
   0xb   : > { %p1811_p5 = por %p192_p2, %p191_p0  ;;  %p1815_p6 = por %p198_p4, %p197_p3 }
   0xc   : > { %p1316_p7 = scmp.ge.s32.totalorder %s1723_s27, 1  ;;  %p205_p8 = scmp.lt.s32.totalorder %s1723_s27, 3 }
   0xd   : > { %s2096_s12 = scalar_select %p1815_p6, 1, 0 }
   0xe   : > { %p2094_p9 = scmp.eq.s32.totalorder %s1794_s28, 0  ;;  %p1822_p10 = pnand %p1316_p7, %p205_p8 }
   0xf   : > { %s1725_s14 = smov [#allocation2]   ;;  %s1726_s17 = smov [#allocation5]  }
  0x10   : > { %s217_s15 = sshll.u32 %s1725_s14, 4  ;;  %p1496_p11 = pneg %p1822_p10  ;;  %s218_s15 = int_to_ptr.vmem [resolvable:$true] %s217_s15 }
  0x11   : > { %s230_s18 = sshll.u32 %s1726_s17, 4  ;;  %s1614_s19 = scalar_lea.vmem %s218_s15, 256  ;;  %s231_s18 = int_to_ptr.vmem [resolvable:$true] %s230_s18 }
  0x12   : > { %p1830_p12 = pnand %p2094_p9, %p1496_p11  ;;  %p1615_p0 = scmp.ne.s32.totalorder %s218_s15, %s1614_s19 }
  0x13   : > { %p1622_p3 = scmp.lt.s32.totalorder %s218_s15, %s218_s15  ;;  %p1623_p4 = scmp.lt.s32.totalorder %s1614_s19, %s1614_s19 }
  0x14   : > { %p1605_p13 = pneg %p1830_p12 }
  0x15   : > { %p1624_p7 = por %p1623_p4, %p1622_p3 }
  0x16   : > { %p1617_p1 = pnand %p1615_p0, %p1605_p13 }
  0x18   : > { %p1618_p2 = pneg %p1617_p1 }
  0x1a   : > { %p1625_p8 = pnand %p1624_p7, %p1618_p2 }
  0x1c   : > { %1628 = shalt.err (!%p1625_p8)
}
  0x1d   : > { %s1727_s20 = smov 64   ;;  %s1728_s21 = smov 4  }
  0x1e   : > { %1499 = dma.hbm_to_vmem [thread:$0]  (!%p1830_p12), %s2087_s1, 256, %s218_s15, [#allocation3], %s1727_s20, %s1727_s20, %s1728_s21  }
  0x1f   : > { %s1640_s29 = scalar_lea.vmem %s231_s18, 256  ;;  %p1648_p9 = scmp.lt.s32.totalorder %s231_s18, %s231_s18 }
  0x20   : > { %p1641_p11 = scmp.ne.s32.totalorder %s231_s18, %s1640_s29  ;;  %p1649_p6 = scmp.lt.s32.totalorder %s1640_s29, %s1640_s29 }
  0x22   : > { %p1643_p0 = pnand %p1641_p11, %p1605_p13  ;;  %p1650_p3 = por %p1649_p6, %p1648_p9 }
  0x24   : > { %p1644_p1 = pneg %p1643_p0 }
  0x26   : > { %p1651_p2 = pnand %p1650_p3, %p1644_p1 }
  0x28   : > { %1654 = shalt.err (!%p1651_p2)
}
  0x29   : > { %1502 = dma.hbm_to_vmem [thread:$0]  (!%p1830_p12), %s2088_s2, 256, %s231_s18, [#allocation6], %s1727_s20, %s1727_s20, %s1728_s21  }
  0x2a   : > { %267 = sbr.rel (%p1822_p10) target bundleno = 985 (0x3d9), region = 48  ;;  %p2099_p4 = scmp.eq.s32.totalorder (!%p1822_p10), %s1794_s28, 0 }
  0x2f   : > { %1698 = dma.done.wait (%p2099_p4), [#allocation3], 256   ;;  %p2100_p13 = pmov %p2099_p4 }
  0x30   : > { %p2101_p7 = pmov %p2099_p4 }
  0x31   : > { %1700 = vsyncadd (%p2100_p13), [#allocation3], 4294967040 }
  0x32   : > { %1702 = dma.done.wait (%p2101_p7), [#allocation6], 256   ;;  %p2102_p6 = pmov %p2099_p4 }
  0x33   : > { %s1324_s14 = sshll.u32 %s1794_s28, 3  ;;  %v1729_v0 = vmov 0.0   ;;  %vm1730_vm0 = vmmov 0   ;;  %v1551_v1 = vld [vmem:[#allocation2 + $0x8] sm:$0xff]   ;;  %vm362_vm1 = vcmask 261120   ;;  %v1552_v2 = vld [vmem:[#allocation2] sm:$0xff]   ;;  %v526_v58 = vlaneseq }
  0x34   : > { %1704 = vsyncadd (%p2102_p6), [#allocation6], 4294967040  ;;  %1423 = vmatprep.subr.bf16.mxu1 %v1729_v0  ;;  %p304_p9 = scmp.lt.s32.totalorder %s1324_s14, 15  ;;  %1427 = vmatprep.mubr.msk.bf16.mxu1 %vm1730_vm0, %v1729_v0  ;;  %vm446_vm2 = vcmask 1041409   ;;  %v1553_v3 = vld [vmem:[#allocation5 + $0x8] sm:$0xff]   ;;  %vm449_vm3 = vcmask 1042434  }
  0x35   : > { %1411 = vmatprep.subr.bf16.mxu0 %v1551_v1  ;;  %vm452_vm4 = vcmask 1043459   ;;  %vm455_vm5 = vcmask 1044484   ;;  %vm458_vm6 = vcmask 1045509   ;;  %1424 = vmatpush3.bf16.msra.mxu1 %v1553_v3  ;;  %vm461_vm7 = vcmask 1046534   ;;  %v1554_v14 = vld [vmem:[#allocation5] sm:$0xff]   ;;  %v1555_v27 = vld [vmem:[%s2089_s3 + $0x38] sm:$0xff]  }
  0x36   : > { %s2109_s14 = smov (!%p304_p9, %s1324_s14), 15  ;;  %1412 = vmatpush3.bf16.msra.mxu0 %v1551_v1  ;;  %1425 = vmatprep.subr.bf16.mxu1 %v1729_v0  ;;  %vm463_vm8 = vcmask 1047559   ;;  %v1556_v32 = vld [vmem:[%s2089_s3 + $0x30] sm:$0xff]   ;;  %v1557_v42 = vld [vmem:[%s2089_s3 + $0x28] sm:$0xff]   ;;  %v1558_v48 = vld [vmem:[%s2089_s3 + $0x20] sm:$0xff]   ;;  %v527_v62 = vshrl.u32 %v526_v58, 7 }
  0x37   : > { %s1325_s13 = sshll.u32 %s2109_s14, 3  ;;  %1413 = vmatprep.subr.bf16.mxu0 %v1552_v2  ;;  %v1559_v52 = vld [vmem:[%s2089_s3 + $0x18] sm:$0xff]   ;;  %v1560_v53 = vld [vmem:[%s2089_s3 + $0x10] sm:$0xff]   ;;  %v1561_v54 = vld [vmem:[%s2089_s3 + $0x8] sm:$0xff]   ;;  %v1731_v56 = vmov 1966171168  }
  0x38   : > { %s1869_s17 = scalar_lea.vmem %s2086_s0, %s1325_s13  ;;  %v1562_v55 = vld [vmem:[%s2089_s3] sm:$0xff]   ;;  %v524_v57 = vunpack.c.l.s4 %v1731_v56  ;;  %vm950_vm9 = vcmask 1041408   ;;  %vm780_vm10 = vcmask 31744   ;;  %s300_s29 = sand.u32 1, %s1715_s25  }
  0x39   : > { %v310_v4 = vld [vmem:[%s1869_s17] sm:$0xff]  ;;  %v311_v5 = vld [vmem:[%s1869_s17 + $0x8] sm:$0xff]  ;;  %v312_v6 = vld [vmem:[%s1869_s17 + $0x10] sm:$0xff]  ;;  %1426 = vmatpush3.bf16.msra.mxu1 %v1554_v14  ;;  %s1323_s8 = sshll.u32 %s300_s29, 3  ;;  %s1365_s13 = sshll.u32 %s1794_s28, 7 }
  0x3a   : > { %v318_v7 = vpack.c.bf16 %v310_v4, %v310_v4  ;;  %v319_v8 = vpack.c.bf16 %v311_v5, %v311_v5  ;;  %v1368_v9 = vpack.c.bf16 %v311_v5, %v310_v4  ;;  %v313_v10 = vld [vmem:[%s1869_s17 + $0x18] sm:$0xff]  ;;  %v320_v11 = vpack.c.bf16 %v312_v6, %v312_v6  ;;  %v314_v15 = vld [vmem:[%s1869_s17 + $0x20] sm:$0xff]  ;;  %v315_v16 = vld [vmem:[%s1869_s17 + $0x28] sm:$0xff]  ;;  %1414 = vmatpush3.bf16.msra.mxu0 %v1552_v2  ;;  %s302_s15 = scalar_lea.vmem [#allocation7], %s1323_s8  ;;  %s2044_s19 = scalar_lea.hbm %s2093_s7, %s1365_s13 }
  0x3b   : > { %v321_v12 = vpack.c.bf16 %v313_v10, %v313_v10  ;;  %v1369_v13 = vpack.c.bf16 %v313_v10, %v312_v6  ;;  %v316_v19 = vld [vmem:[%s1869_s17 + $0x30] sm:$0xff]  ;;  %v317_v20 = vld [vmem:[%s1869_s17 + $0x38] sm:$0xff]  ;;  %v322_v21 = vpack.c.bf16 %v314_v15, %v314_v15  ;;  %v323_v22 = vpack.c.bf16 %v315_v16, %v315_v16  ;;  %1431 = vmatprep.subr.bf16.mxu0 %v1555_v27  ;;  %s1234_s16 = sshll.u32 %s302_s15, 4  ;;  %s1221_s20 = scalar_lea.sflag [#allocation4], %s300_s29  ;;  %s2046_s16 = int_to_ptr.vmem [resolvable:$true] %s1234_s16 }
  0x3c   : > { %v338_v17 = vunpack.c.l.b16 %v318_v7  ;;  %v339_v18 = vunpack.c.l.b16 %v319_v8  ;;  %1415 = vmatprep.mubr.msk.bf16.mxu0 %vm362_vm1, %v1368_v9  ;;  %v340_v23 = vunpack.c.l.b16 %v320_v11  ;;  %v324_v25 = vpack.c.bf16 %v316_v19, %v316_v19  ;;  %s1655_s28 = scalar_lea.vmem %s2046_s16, 128  ;;  %s1732_s21 = smov [#allocation7]  }
  0x3d   : > { %v341_v24 = vunpack.c.l.b16 %v321_v12  ;;  %v325_v26 = vpack.c.bf16 %v317_v20, %v317_v20  ;;  %v342_v30 = vunpack.c.l.b16 %v322_v21  ;;  %v343_v31 = vunpack.c.l.b16 %v323_v22  ;;  %1416 = vmatmul.mubr.msk.bf16.vlgmr.msra.gmra.mxu0 %vm362_vm1, %v1369_v13  ;;  %p1656_p10 = scmp.ne.s32.totalorder %s2046_s16, %s1655_s28  ;;  %s1659_s22 = sshll.u32 %s1732_s21, 4  ;;  %s1660_s22 = int_to_ptr.vmem [resolvable:$false] %s1659_s22 }
  0x3e   : > { %v444_v28 = vrot.slane %v338_v17, 7  ;;  %v445_v29 = vrot.slane %v339_v18, 6  ;;  %v448_v33 = vrot.slane %v340_v23, 5  ;;  %v344_v35 = vunpack.c.l.b16 %v324_v25  ;;  %1432 = vmatpush3.bf16.msra.mxu0 %v1555_v27  ;;  %s1661_s23 = scalar_lea.vmem %s1660_s22, 256  ;;  %p1662_p11 = scmp.lt.s32.totalorder %s2046_s16, %s1660_s22 }
  0x3f   : > { %v451_v34 = vrot.slane %v341_v24, 4  ;;  %v454_v37 = vrot.slane %v342_v30, 3  ;;  %v457_v38 = vrot.slane %v343_v31, 2  ;;  %v1370_v39 = vpack.c.bf16 %v315_v16, %v314_v15  ;;  %1433 = vmatprep.subr.bf16.mxu0 %v1556_v32  ;;  %p1657_p12 = pnand %p1656_p10, %p1811_p5  ;;  %p1663_p0 = scmp.lt.s32.totalorder %s1661_s23, %s1655_s28 }
  0x40   : > { %v447_v36 = vsel %vm446_vm2, %v445_v29, %v444_v28  ;;  %v460_v41 = vrot.slane %v344_v35, 1  ;;  %v345_v44 = vunpack.c.l.b16 %v325_v26  ;;  %v1371_v47 = vpack.c.bf16 %v317_v20, %v316_v19 }
  0x41   : > { %v450_v40 = vsel %vm449_vm3, %v448_v33, %v447_v36  ;;  %1419 = vmatprep.mubr.msk.bf16.mxu0 %vm362_vm1, %v1370_v39  ;;  %v525_v61 = vunpack.c.0.s8 %v524_v57  ;;  %v573_v7 = vsub.s32 0, %v527_v62  ;;  %p1658_p8 = pneg %p1657_p12  ;;  %p1664_p1 = por %p1663_p0, %p1662_p11 }
  0x42   : > { %v453_v43 = vsel %vm452_vm4, %v451_v34, %v450_v40  ;;  %1434 = vmatpush3.bf16.msra.mxu0 %v1556_v32 }
  0x43   : > { %v456_v45 = vsel %vm455_vm5, %v454_v37, %v453_v43  ;;  %1435 = vmatprep.subr.bf16.mxu0 %v1557_v42  ;;  %v528_v1 = vsub.s32 %v525_v61, %v527_v62  ;;  %p1665_p3 = pnand %p1664_p1, %p1658_p8 }
  0x44   : > { %v459_v46 = vsel %vm458_vm6, %v457_v38, %v456_v45  ;;  %v937_v45 = vld [vmem:[%s2090_s4] sm:$0x3] }
  0x45   : > { %v462_v49 = vsel %vm461_vm7, %v460_v41, %v459_v46  ;;  %1420 = vmatmul.mubr.msk.bf16.gmra.mxu0 %vm362_vm1, %v1371_v47  ;;  %1485 = vmatprep.subr.msk.bf16.mxu1 %vm950_vm9, %v937_v45  ;;  %v952_v46 = vsel %vm950_vm9, %v937_v45, 0 }
  0x46   : > { %v464_v50 = vsel %vm463_vm8, %v345_v44, %v462_v49  ;;  %1436 = vmatpush3.bf16.msra.mxu0 %v1557_v42 }
  0x47   : > { %v465_v51 = vpack.c.b16 %v464_v50, %v464_v50  ;;  %1437 = vmatprep.subr.bf16.mxu0 %v1558_v48 }
  0x49   : > { %1428 = vmatmul.mubr.msk.bf16.vlgmr.msra.gmra.mxu1 %vm362_vm1, %v465_v51 }
  0x4a   : > { %1438 = vmatpush3.bf16.msra.mxu0 %v1558_v48  ;;  %1456 = vmatpush3.bf16.msra.mxu1 %v952_v46 }
  0x4b   : > { %1439 = vmatprep.subr.bf16.mxu0 %v1559_v52  ;;  %1465 = vmatprep.subr.bf16.mxu1 %v1729_v0 }
  0x4e   : > { %1440 = vmatpush3.bf16.msra.mxu0 %v1559_v52 }
  0x4f   : > { %1441 = vmatprep.subr.bf16.mxu0 %v1560_v53 }
  0x52   : > { %1442 = vmatpush3.bf16.msra.mxu0 %v1560_v53 }
  0x53   : > { %1443 = vmatprep.subr.bf16.mxu0 %v1561_v54 }
  0x56   : > { %1444 = vmatpush3.bf16.msra.mxu0 %v1561_v54 }
  0x57   : > { %1445 = vmatprep.subr.bf16.mxu0 %v1562_v55 }
  0x5a   : > { %1446 = vmatpush3.bf16.msra.mxu0 %v1562_v55 }
  0xfd   : > { %v1916_v59 = vpop.f32.mrf.mxu0 }
  0xff   : > { %v1918_v60 = vpop.f32.mrf.mxu0 }
 0x101   : > { %v1920_v63 = vpop.f32.mrf.mxu0 }
 0x103   : > { %v1922_v2 = vpop.f32.mrf.mxu0 }
 0x105   : > { %v1924_v3 = vpop.f32.mrf.mxu0 }
 0x107   : > { %v1926_v8 = vpop.f32.mrf.mxu0 }
 0x109   : > { %v515_v4 = vpop.f32.mrf.mxu1  ;;  %v1928_v18 = vpop.f32.mrf.mxu0 }
 0x10a   : > { %v522_v5 = vcombine.high %v515_v4, %v515_v4  ;;  %v529_v6 = vrot.slane %v515_v4, %v528_v1 }
 0x10b   : > { %v1429_v9 = vpop.f32.mrf.mxu1  ;;  %v1931_v27 = vpop.f32.mrf.mxu0 }
 0x10c   : > { %v536_v10 = vrot.slane %v522_v5, %v528_v1  ;;  %v537_v11 = vcombine.high %v529_v6, %v529_v6  ;;  %v545_v12 = vrot.slane %v529_v6, %v528_v1 }
 0x10d   : > { %v518_v13 = vpop.f32.mrf.mxu1 }
 0x10e   : > { %v538_v14 = vcombine.high %v536_v10, %v536_v10  ;;  %v552_v15 = vrot.slane %v536_v10, %v528_v1  ;;  %v567_v16 = vcombine.high %v545_v12, %v545_v12  ;;  %v574_v17 = vrot.slane %v545_v12, %v573_v7 }
 0x10f   : > { %v559_v19 = vrot.slane %v537_v11, %v528_v1  ;;  %v1430_v20 = vpop.f32.mrf.mxu1 }
 0x110   : > { %v582_v21 = vrot.slane %v567_v16, %v573_v7  ;;  %v590_v24 = vrot.slane %v552_v15, %v573_v7  ;;  %v566_v25 = vrot.slane %v538_v14, %v528_v1  ;;  %v611_v26 = vmul.f32 %v574_v17, %v1918_v60 }
 0x111   : > { %v569_v22 = vcombine.high %v559_v19, %v559_v19  ;;  %v578_v23 = vrot.slane %v559_v19, %v573_v7  ;;  %v568_v33 = vcombine.high %v552_v15, %v552_v15 }
 0x112   : > { %v570_v30 = vcombine.high %v566_v25, %v566_v25  ;;  %v594_v31 = vrot.slane %v566_v25, %v573_v7  ;;  %v613_v32 = vmul.f32 %v1916_v59, %v582_v21  ;;  %v615_v36 = vmul.f32 %v590_v24, %v1926_v8 }
 0x113   : > { %v586_v28 = vrot.slane %v569_v22, %v573_v7  ;;  %v612_v29 = vmul.f32 %v578_v23, %v1922_v2  ;;  %v598_v41 = vrot.slane %v568_v33, %v573_v7 }
 0x114   : > { %v616_v37 = vmul.f32 %v594_v31, %v1931_v27  ;;  %v602_v38 = vrot.slane %v570_v30, %v573_v7 }
 0x115   : > { %v614_v34 = vmul.f32 %v1920_v63, %v586_v28  ;;  %v1372_v35 = vpack.c.bf16 %v612_v29, %v611_v26  ;;  %v617_v43 = vmul.f32 %v1924_v3, %v598_v41 }
 0x116   : > { %v1374_v39 = vpack.c.bf16 %v616_v37, %v615_v36  ;;  %v618_v42 = vmul.f32 %v1928_v18, %v602_v38 }
 0x117   : > { %1447 = vmatprep.mubr.bf16.mxu0 %v1372_v35  ;;  %v1373_v40 = vpack.c.bf16 %v614_v34, %v613_v32 }
 0x118   : > { %v1375_v44 = vpack.c.bf16 %v618_v42, %v617_v43 }
 0x119   : > { %1448 = vmatmul.mubr.bf16.vlgmr.msra.gmra.mxu0 %v1373_v40 }
 0x11a   : > { %1451 = vmatprep.mubr.bf16.mxu0 %v1374_v39 }
 0x121   : > { %1452 = vmatmul.mubr.bf16.gmra.mxu0 %v1375_v44 }
 0x1d9   : > { %v1449_v47 = vpop.f32.mrf.mxu0 }
 0x1da   : > { %v795_v48 = vsel %vm780_vm10, %v1449_v47, -inf }
 0x1db   : > { %v796_v49 = vrot.slane %v795_v48, 4  ;;  %v749_v50 = vpop.f32.mrf.mxu0 }
 0x1dc   : > { %v781_v51 = vsel %vm780_vm10, %v749_v50, -inf }
 0x1dd   : > { %v797_v52 = vmax.f32 %v795_v48, %v796_v49  ;;  %v782_v53 = vrot.slane %v781_v51, 4  ;;  %v1450_v54 = vpop.f32.mrf.mxu0 }
 0x1de   : > { %v802_v55 = vsel %vm780_vm10, %v1450_v54, -inf }
 0x1df   : > { %v798_v56 = vrot.slane %v797_v52, 2  ;;  %v783_v57 = vmax.f32 %v781_v51, %v782_v53  ;;  %v803_v58 = vrot.slane %v802_v55, 4  ;;  %v752_v61 = vpop.f32.mrf.mxu0 }
 0x1e0   : > { %v788_v62 = vsel %vm780_vm10, %v752_v61, -inf }
 0x1e1   : > { %v799_v1 = vmax.f32 %v797_v52, %v798_v56  ;;  %v784_v4 = vrot.slane %v783_v57, 2  ;;  %v804_v5 = vmax.f32 %v802_v55, %v803_v58  ;;  %v789_v6 = vrot.slane %v788_v62, 4  ;;  %v1453_v7 = vpop.f32.mrf.mxu0 }
 0x1e2   : > { %v823_v9 = vsel %vm780_vm10, %v1453_v7, -inf }
 0x1e3   : > { %v800_v10 = vrot.slane %v799_v1, 1  ;;  %v785_v11 = vmax.f32 %v783_v57, %v784_v4  ;;  %v805_v12 = vrot.slane %v804_v5, 2  ;;  %v790_v13 = vmax.f32 %v788_v62, %v789_v6  ;;  %v765_v14 = vpop.f32.mrf.mxu0 }
 0x1e4   : > { %v824_v15 = vrot.slane %v823_v9, 4  ;;  %v809_v16 = vsel %vm780_vm10, %v765_v14, -inf }
 0x1e5   : > { %v801_v17 = vmax.f32 %v799_v1, %v800_v10  ;;  %v786_v19 = vrot.slane %v785_v11, 1  ;;  %v806_v20 = vmax.f32 %v804_v5, %v805_v12  ;;  %v791_v21 = vrot.slane %v790_v13, 2  ;;  %v1454_v22 = vpop.f32.mrf.mxu0 }
 0x1e6   : > { %v825_v23 = vmax.f32 %v823_v9, %v824_v15  ;;  %v810_v24 = vrot.slane %v809_v16, 4  ;;  %v830_v25 = vsel %vm780_vm10, %v1454_v22, -inf }
 0x1e7   : > { %v839_v26 = vsub.f32 %v1449_v47, %v801_v17  ;;  %v787_v28 = vmax.f32 %v785_v11, %v786_v19  ;;  %v807_v29 = vrot.slane %v806_v20, 1  ;;  %v792_v30 = vmax.f32 %v790_v13, %v791_v21  ;;  %v768_v31 = vpop.f32.mrf.mxu0 }
 0x1e8   : > { %v826_v32 = vrot.slane %v825_v23, 2  ;;  %v811_v33 = vmax.f32 %v809_v16, %v810_v24  ;;  %v831_v34 = vrot.slane %v830_v25, 4  ;;  %v816_v35 = vsel %vm780_vm10, %v768_v31, -inf }
 0x1e9   : > { %v849_v36 = vmul.f32 1.442695, %v839_v26  ;;  %v837_v37 = vsub.f32 %v749_v50, %v787_v28  ;;  %v808_v38 = vmax.f32 %v806_v20, %v807_v29  ;;  %v793_v39 = vrot.slane %v792_v30, 1 }
 0x1ea   : > { %v827_v40 = vmax.f32 %v825_v23, %v826_v32  ;;  %v812_v41 = vrot.slane %v811_v33, 2  ;;  %v832_v42 = vmax.f32 %v830_v25, %v831_v34  ;;  %v817_v43 = vrot.slane %v816_v35, 4 }
 0x1eb   : > { %1571 = vpow2.f32 %v849_v36  ;;  %v845_v44 = vmul.f32 1.442695, %v837_v37  ;;  %v840_v45 = vsub.f32 %v1450_v54, %v808_v38  ;;  %v794_v46 = vmax.f32 %v792_v30, %v793_v39 }
 0x1ec   : > { %v828_v47 = vrot.slane %v827_v40, 1  ;;  %v813_v48 = vmax.f32 %v811_v33, %v812_v41  ;;  %v833_v49 = vrot.slane %v832_v42, 2  ;;  %v818_v51 = vmax.f32 %v816_v35, %v817_v43 }
 0x1ed   : > { %1573 = vpow2.f32 %v845_v44  ;;  %v851_v52 = vmul.f32 1.442695, %v840_v45  ;;  %v838_v53 = vsub.f32 %v752_v61, %v794_v46 }
 0x1ee   : > { %v829_v55 = vmax.f32 %v827_v40, %v828_v47  ;;  %v814_v56 = vrot.slane %v813_v48, 1  ;;  %v834_v50 = vmax.f32 %v832_v42, %v833_v49  ;;  %v819_v57 = vrot.slane %v818_v51, 2 }
 0x1ef   : > { %1575 = vpow2.f32 %v851_v52  ;;  %v847_v58 = vmul.f32 1.442695, %v838_v53 }
 0x1f0   : > { %v843_v62 = vsub.f32 %v1453_v7, %v829_v55  ;;  %v815_v1 = vmax.f32 %v813_v48, %v814_v56  ;;  %v835_v4 = vrot.slane %v834_v50, 1  ;;  %v820_v5 = vmax.f32 %v818_v51, %v819_v57 }
 0x1f1   : > { %1577 = vpow2.f32 %v847_v58 }
 0x1f2   : > { %v857_v54 = vmul.f32 1.442695, %v843_v62  ;;  %v841_v6 = vsub.f32 %v765_v14, %v815_v1  ;;  %v836_v9 = vmax.f32 %v834_v50, %v835_v4  ;;  %v821_v10 = vrot.slane %v820_v5, 1 }
 0x1f4   : > { %1579 = vpow2.f32 %v857_v54  ;;  %v853_v11 = vmul.f32 1.442695, %v841_v6  ;;  %v844_v12 = vsub.f32 %v1454_v22, %v836_v9  ;;  %v822_v13 = vmax.f32 %v820_v5, %v821_v10 }
 0x1f6   : > { %1581 = vpow2.f32 %v853_v11  ;;  %v859_v61 = vmul.f32 1.442695, %v844_v12  ;;  %v842_v15 = vsub.f32 %v768_v31, %v822_v13 }
 0x1f8   : > { %v1952_v16 = vpop.eup %1571  ;;  %1583 = vpow2.f32 %v859_v61  ;;  %v855_v17 = vmul.f32 1.442695, %v842_v15 }
 0x1f9   : > { %v875_v7 = vsel %vm780_vm10, %v1952_v16, 0.0 }
 0x1fa   : > { %v1956_v19 = vpop.eup %1573  ;;  %v876_v20 = vrot.slane %v875_v7, 4  ;;  %1585 = vpow2.f32 %v855_v17 }
 0x1fb   : > { %v861_v14 = vsel %vm780_vm10, %v1956_v19, 0.0 }
 0x1fc   : > { %v1960_v21 = vpop.eup %1575  ;;  %v877_v22 = vadd.f32 %v876_v20, %v875_v7  ;;  %v862_v23 = vrot.slane %v861_v14, 4 }
 0x1fd   : > { %v882_v24 = vsel %vm780_vm10, %v1960_v21, 0.0 }
 0x1fe   : > { %v1964_v25 = vpop.eup %1577  ;;  %v878_v26 = vrot.slane %v877_v22, 2  ;;  %v863_v28 = vadd.f32 %v862_v23, %v861_v14  ;;  %v883_v29 = vrot.slane %v882_v24, 4 }
 0x1ff   : > { %v868_v30 = vsel %vm780_vm10, %v1964_v25, 0.0 }
 0x200   : > { %v879_v31 = vadd.f32 %v878_v26, %v877_v22  ;;  %v864_v32 = vrot.slane %v863_v28, 2  ;;  %v884_v33 = vadd.f32 %v883_v29, %v882_v24  ;;  %v869_v34 = vrot.slane %v868_v30, 4 }
 0x201   : > { %v1968_v35 = vpop.eup %1579 }
 0x202   : > { %v865_v36 = vadd.f32 %v864_v32, %v863_v28  ;;  %v885_v37 = vrot.slane %v884_v33, 2  ;;  %v870_v38 = vadd.f32 %v869_v34, %v868_v30  ;;  %v880_v40 = vrot.slane %v879_v31, 1 }
 0x203   : > { %v1970_v39 = vpop.eup %1581  ;;  %v903_v41 = vsel %vm780_vm10, %v1968_v35, 0.0 }
 0x204   : > { %v866_v42 = vrot.slane %v865_v36, 1  ;;  %v886_v43 = vadd.f32 %v885_v37, %v884_v33  ;;  %v871_v44 = vrot.slane %v870_v38, 2  ;;  %v904_v46 = vrot.slane %v903_v41, 4 }
 0x205   : > { %v1584_v45 = vpop.eup %1583  ;;  %v889_v47 = vsel %vm780_vm10, %v1970_v39, 0.0  ;;  %v881_v53 = vadd.f32 %v880_v40, %v879_v31 }
 0x206   : > { %v867_v48 = vadd.f32 %v866_v42, %v865_v36  ;;  %v887_v49 = vrot.slane %v886_v43, 1  ;;  %v872_v51 = vadd.f32 %v871_v44, %v870_v38  ;;  %v905_v55 = vadd.f32 %v904_v46, %v903_v41 }
 0x207   : > { %v1586_v52 = vpop.eup %1585  ;;  %v890_v56 = vrot.slane %v889_v47, 4  ;;  %v910_v50 = vsel %vm780_vm10, %v1584_v45, 0.0 }
 0x208   : > { %v888_v57 = vadd.f32 %v887_v49, %v886_v43  ;;  %v873_v58 = vrot.slane %v872_v51, 1  ;;  %v911_v62 = vrot.slane %v910_v50, 4  ;;  %1587 = vrcp.f32 %v867_v48 }
 0x209   : > { %v906_v1 = vrot.slane %v905_v55, 2  ;;  %v891_v4 = vadd.f32 %v890_v56, %v889_v47  ;;  %v896_v5 = vsel %vm780_vm10, %v1586_v52, 0.0 }
 0x20a   : > { %1589 = vrcp.f32 %v888_v57  ;;  %v874_v54 = vadd.f32 %v873_v58, %v872_v51  ;;  %v912_v6 = vadd.f32 %v911_v62, %v910_v50  ;;  %v897_v9 = vrot.slane %v896_v5, 4  ;;  %v1567_v51 = vld [vmem:[%s2091_s5 + $0x18] sm:$0xff]  }
 0x20b   : > { %1591 = vrcp.f32 %v881_v53  ;;  %v907_v10 = vadd.f32 %v906_v1, %v905_v55  ;;  %v892_v11 = vrot.slane %v891_v4, 2  ;;  %v1569_v53 = vld [vmem:[%s2091_s5 + $0x8] sm:$0xff]   ;;  %v1570_v55 = vld [vmem:[%s2091_s5] sm:$0xff]  }
 0x20c   : > { %1593 = vrcp.f32 %v874_v54  ;;  %v913_v12 = vrot.slane %v912_v6, 2  ;;  %v898_v13 = vadd.f32 %v897_v9, %v896_v5 }
 0x20d   : > { %v908_v61 = vrot.slane %v907_v10, 1  ;;  %v893_v15 = vadd.f32 %v892_v11, %v891_v4 }
 0x20e   : > { %v914_v17 = vadd.f32 %v913_v12, %v912_v6  ;;  %v899_v7 = vrot.slane %v898_v13, 2 }
 0x20f   : > { %v894_v20 = vrot.slane %v893_v15, 1  ;;  %v909_v23 = vadd.f32 %v908_v61, %v907_v10 }
 0x210   : > { %v915_v14 = vrot.slane %v914_v17, 1  ;;  %v900_v22 = vadd.f32 %v899_v7, %v898_v13 }
 0x211   : > { %v895_v24 = vadd.f32 %v894_v20, %v893_v15 }
 0x212   : > { %v916_v26 = vadd.f32 %v915_v14, %v914_v17  ;;  %v901_v28 = vrot.slane %v900_v22, 1 }
 0x213   : > { %1595 = vrcp.f32 %v895_v24 }
 0x214   : > { %1597 = vrcp.f32 %v916_v26  ;;  %v902_v29 = vadd.f32 %v901_v28, %v900_v22 }
 0x215   : > { %1599 = vrcp.f32 %v909_v23  ;;  %v1588_v30 = vpop.eup %1587 }
 0x216   : > { %1601 = vrcp.f32 %v902_v29  ;;  %v925_v36 = vmul.f32 %v1588_v30, %v1956_v19 }
 0x217   : > { %v1590_v31 = vpop.eup %1589 }
 0x218   : > { %v1592_v32 = vpop.eup %1591  ;;  %v928_v34 = vmul.f32 %v1590_v31, %v1960_v21 }
 0x219   : > { %v1594_v33 = vpop.eup %1593  ;;  %v927_v38 = vmul.f32 %v1592_v32, %v1952_v16  ;;  %v1563_v16 = vld [vmem:[%s2091_s5 + $0x38] sm:$0xff]  }
 0x21a   : > { %v926_v37 = vmul.f32 %v1594_v33, %v1964_v25 }
 0x21b   : > { %v934_v41 = vpack.c.bf16 %v928_v34, %v927_v38 }
 0x21c   : > { %v933_v40 = vpack.c.bf16 %v926_v37, %v925_v36 }
 0x21e   : > { %1457 = vmatprep.mubr.msk.bf16.mxu1 %vm780_vm10, %v933_v40 }
 0x21f   : > { %1458 = vmatmul.mubr.msk.bf16.vlgmr.msra.gmra.mxu1 %vm780_vm10, %v934_v41 }
 0x220   : > { %v1596_v42 = vpop.eup %1595  ;;  %1466 = vmatpush3.bf16.msra.mxu1 %v1563_v16 }
 0x221   : > { %v1598_v43 = vpop.eup %1597  ;;  %v929_v48 = vmul.f32 %v1596_v42, %v1970_v39  ;;  %1467 = vmatprep.subr.bf16.mxu1 %v1729_v0  ;;  %v1565_v39 = vld [vmem:[%s2091_s5 + $0x28] sm:$0xff]  }
 0x222   : > { %v1600_v44 = vpop.eup %1599  ;;  %v932_v47 = vmul.f32 %v1598_v43, %v1584_v45  ;;  %v1566_v45 = vld [vmem:[%s2091_s5 + $0x20] sm:$0xff]  }
 0x223   : > { %v1602_v46 = vpop.eup %1601  ;;  %v931_v19 = vmul.f32 %v1600_v44, %v1968_v35  ;;  %v1564_v35 = vld [vmem:[%s2091_s5 + $0x30] sm:$0xff]  }
 0x224   : > { %v930_v21 = vmul.f32 %v1602_v46, %v1586_v52  ;;  %1468 = vmatpush3.bf16.msra.mxu1 %v1564_v35  ;;  %v1568_v52 = vld [vmem:[%s2091_s5 + $0x10] sm:$0xff]  }
 0x225   : > { %v936_v25 = vpack.c.bf16 %v932_v47, %v931_v19  ;;  %1469 = vmatprep.subr.bf16.mxu1 %v1729_v0 }
 0x226   : > { %v935_v49 = vpack.c.bf16 %v930_v21, %v929_v48 }
 0x228   : > { %1461 = vmatprep.mubr.msk.bf16.mxu1 %vm780_vm10, %v935_v49  ;;  %1470 = vmatpush3.bf16.msra.mxu1 %v1565_v39 }
 0x229   : > { %1462 = vmatmul.mubr.msk.bf16.gmra.mxu1 %vm780_vm10, %v936_v25  ;;  %1471 = vmatprep.subr.bf16.mxu1 %v1729_v0 }
 0x22a   : > { %1481 = vmatprep.mubr.msk.bf16.mxu1 %vm1730_vm0, %v1729_v0 }
 0x22c   : > { %1472 = vmatpush3.bf16.msra.mxu1 %v1566_v45 }
 0x22d   : > { %1473 = vmatprep.subr.bf16.mxu1 %v1729_v0 }
 0x230   : > { %1474 = vmatpush3.bf16.msra.mxu1 %v1567_v51 }
 0x231   : > { %1475 = vmatprep.subr.bf16.mxu1 %v1729_v0 }
 0x234   : > { %1476 = vmatpush3.bf16.msra.mxu1 %v1568_v52 }
 0x235   : > { %1477 = vmatprep.subr.bf16.mxu1 %v1729_v0 }
 0x238   : > { %1478 = vmatpush3.bf16.msra.mxu1 %v1569_v53 }
 0x239   : > { %1479 = vmatprep.subr.bf16.mxu1 %v1729_v0 }
 0x23c   : > { %1480 = vmatpush3.bf16.msra.mxu1 %v1570_v55 }
 0x2df   : > { %v1459_v56 = vpop.f32.mrf.mxu1 }
 0x2e0   : > { %v1021_v50 = vmul.f32 %v1459_v56, %v1916_v59 }
 0x2e1   : > { %v988_v57 = vpop.f32.mrf.mxu1 }
 0x2e2   : > { %v1039_v58 = vrot.slane %v1021_v50, 4  ;;  %v1019_v62 = vmul.f32 %v988_v57, %v1918_v60 }
 0x2e3   : > { %v1460_v1 = vpop.f32.mrf.mxu1 }
 0x2e4   : > { %v1040_v4 = vadd.f32 %v1039_v58, %v1021_v50  ;;  %v1027_v5 = vrot.slane %v1019_v62, 4  ;;  %v1022_v54 = vmul.f32 %v1460_v1, %v1920_v63 }
 0x2e5   : > { %v991_v6 = vpop.f32.mrf.mxu1 }
 0x2e6   : > { %v1041_v9 = vrot.slane %v1040_v4, 2  ;;  %v1028_v0 = vadd.f32 %v1027_v5, %v1019_v62  ;;  %v1045_v10 = vrot.slane %v1022_v54, 4  ;;  %v1020_v11 = vmul.f32 %v991_v6, %v1922_v2 }
 0x2e8   : > { %v1029_v12 = vrot.slane %v1028_v0, 2  ;;  %v1046_v13 = vadd.f32 %v1045_v10, %v1022_v54  ;;  %v1033_v61 = vrot.slane %v1020_v11, 4  ;;  %v1042_v59 = vadd.f32 %v1041_v9, %v1040_v4 }
 0x2e9   : > { %v1463_v15 = vpop.f32.mrf.mxu1 }
 0x2ea   : > { %v1030_v17 = vadd.f32 %v1029_v12, %v1028_v0  ;;  %v1047_v7 = vrot.slane %v1046_v13, 2  ;;  %v1034_v20 = vadd.f32 %v1033_v61, %v1020_v11  ;;  %v1025_v60 = vmul.f32 %v1463_v15, %v1924_v3 }
 0x2eb   : > { %v1004_v14 = vpop.f32.mrf.mxu1  ;;  %v1043_v28 = vrot.slane %v1042_v59, 1 }
 0x2ec   : > { %v1031_v22 = vrot.slane %v1030_v17, 1  ;;  %v1035_v23 = vrot.slane %v1034_v20, 2  ;;  %v1063_v63 = vrot.slane %v1025_v60, 4  ;;  %v1023_v24 = vmul.f32 %v1004_v14, %v1926_v8 }
 0x2ed   : > { %v1464_v26 = vpop.f32.mrf.mxu1  ;;  %v1048_v29 = vadd.f32 %v1047_v7, %v1046_v13  ;;  %v1044_v41 = vadd.f32 %v1043_v28, %v1042_v59 }
 0x2ee   : > { %v1036_v2 = vadd.f32 %v1035_v23, %v1034_v20  ;;  %v1064_v30 = vadd.f32 %v1063_v63, %v1025_v60  ;;  %v1051_v31 = vrot.slane %v1023_v24, 4  ;;  %v1026_v32 = vmul.f32 %v1464_v26, %v1928_v18 }
 0x2ef   : > { %v1007_v33 = vpop.f32.mrf.mxu1  ;;  %v1032_v34 = vadd.f32 %v1031_v22, %v1030_v17  ;;  %v1049_v42 = vrot.slane %v1048_v29, 1  ;;  %v1077_v25 = vpack.c.bf16 %v1044_v41, %v1044_v41  ;;  %v1355_v22 = vld [vmem:[%s2092_s6] ss:$0 sm:$0xff] }
 0x2f0   : > { %v1037_v36 = vrot.slane %v1036_v2, 1  ;;  %v1065_v37 = vrot.slane %v1064_v30, 2  ;;  %v1052_v38 = vadd.f32 %v1051_v31, %v1023_v24  ;;  %v1069_v3 = vrot.slane %v1026_v32, 4 }
 0x2f1   : > { %v1024_v40 = vmul.f32 %v1007_v33, %v1931_v27  ;;  %v1075_v48 = vpack.c.bf16 %v1032_v34, %v1032_v34  ;;  %v1050_v16 = vadd.f32 %v1049_v42, %v1048_v29  ;;  %v1116_v58 = vunpack.c.l.b16 %v1077_v25 }
 0x2f2   : > { %v1038_v43 = vadd.f32 %v1037_v36, %v1036_v2  ;;  %v1066_v8 = vadd.f32 %v1065_v37, %v1064_v30  ;;  %v1053_v44 = vrot.slane %v1052_v38, 2  ;;  %v1070_v46 = vadd.f32 %v1069_v3, %v1026_v32 }
 0x2f3   : > { %v1057_v47 = vrot.slane %v1024_v40, 4  ;;  %v1114_v27 = vunpack.c.l.b16 %v1075_v48  ;;  %v1078_v56 = vpack.c.bf16 %v1050_v16, %v1050_v16 }
 0x2f4   : > { %v1076_v21 = vpack.c.bf16 %v1038_v43, %v1038_v43  ;;  %v1054_v19 = vadd.f32 %v1053_v44, %v1052_v38  ;;  %v1071_v49 = vrot.slane %v1070_v46, 2  ;;  %v1067_v39 = vrot.slane %v1066_v8, 1 }
 0x2f5   : > { %v1058_v18 = vadd.f32 %v1057_v47, %v1024_v40  ;;  %v1117_v6 = vunpack.c.l.b16 %v1078_v56 }
 0x2f6   : > { %v1115_v35 = vunpack.c.l.b16 %v1076_v21  ;;  %v1055_v45 = vrot.slane %v1054_v19, 1  ;;  %v1072_v51 = vadd.f32 %v1071_v49, %v1070_v46  ;;  %v1068_v62 = vadd.f32 %v1067_v39, %v1066_v8 }
 0x2f7   : > { %v1059_v52 = vrot.slane %v1058_v18, 2 }
 0x2f8   : > { %v1056_v53 = vadd.f32 %v1055_v45, %v1054_v19  ;;  %v1073_v55 = vrot.slane %v1072_v51, 1  ;;  %v1122_v50 = vsel %vm446_vm2, %v1115_v35, %v1114_v27  ;;  %v1081_v0 = vpack.c.bf16 %v1068_v62, %v1068_v62 }
 0x2f9   : > { %v1060_v57 = vadd.f32 %v1059_v52, %v1058_v18  ;;  %v1123_v54 = vsel %vm449_vm3, %v1116_v58, %v1122_v50 }
 0x2fa   : > { %v1079_v1 = vpack.c.bf16 %v1056_v53, %v1056_v53  ;;  %v1074_v4 = vadd.f32 %v1073_v55, %v1072_v51  ;;  %v1124_v11 = vsel %vm452_vm4, %v1117_v6, %v1123_v54  ;;  %v1120_v15 = vunpack.c.l.b16 %v1081_v0 }
 0x2fb   : > { %v1061_v5 = vrot.slane %v1060_v57, 1 }
 0x2fc   : > { %v1118_v10 = vunpack.c.l.b16 %v1079_v1  ;;  %v1082_v12 = vpack.c.bf16 %v1074_v4, %v1074_v4 }
 0x2fd   : > { %v1062_v9 = vadd.f32 %v1061_v5, %v1060_v57 }
 0x2fe   : > { %v1125_v59 = vsel %vm455_vm5, %v1118_v10, %v1124_v11  ;;  %v1121_v17 = vunpack.c.l.b16 %v1082_v12 }
 0x2ff   : > { %v1080_v13 = vpack.c.bf16 %v1062_v9, %v1062_v9 }
 0x301   : > { %v1119_v61 = vunpack.c.l.b16 %v1080_v13 }
 0x303   : > { %v1126_v7 = vsel %vm458_vm6, %v1119_v61, %v1125_v59 }
 0x304   : > { %v1127_v20 = vsel %vm461_vm7, %v1120_v15, %v1126_v7 }
 0x305   : > { %v1128_v60 = vsel %vm463_vm8, %v1121_v17, %v1127_v20 }
 0x306   : > { %v1129_v14 = vpack.c.b16 %v1128_v60, %v1128_v60 }
 0x308   : > { %1482 = vmatmul.mubr.bf16.vlgmr.msra.gmra.mxu1 %v1129_v14 }
 0x3c8   : > { %v1213_v23 = vpop.f32.mrf.mxu1 }
 0x3c9   : > { %v1214_v63 = vadd.f32 %v1355_v22, %v1213_v23 }
 0x3ca   : > { %v1483_v24 = vpop.f32.mrf.mxu1 }
 0x3cb   : > { %1219 = vst.msk [vmem:[%s302_s15] sm:$0xff] %vm362_vm1, %v1214_v63 }
 0x3cc   : > { %v1216_v26 = vpop.f32.mrf.mxu1 }
 0x3cd   : > { %1668 = shalt.err (!%p1665_p3)
}
 0x3ce   : > { %s1669_s8 = scalar_lea.hbm %s2044_s19, 128  ;;  %s1673_s14 = scalar_lea.hbm %s2093_s7, 256 }
 0x3cf   : > { %p1670_p2 = scmp.ne.s32.totalorder %s2044_s19, %s1669_s8  ;;  %p1674_p7 = scmp.lt.s32.totalorder %s2044_s19, %s2093_s7 }
 0x3d0   : > { %p1675_p6 = scmp.lt.s32.totalorder %s1673_s14, %s1669_s8 }
 0x3d1   : > { %p1671_p4 = pnand %p1670_p2, %p1811_p5 }
 0x3d2   : > { %p1676_p9 = por %p1675_p6, %p1674_p7 }
 0x3d3   : > { %p1672_p13 = pneg %p1671_p4 }
 0x3d5   : > { %p1677_p10 = pnand %p1676_p9, %p1672_p13 }
 0x3d7   : > { %1680 = shalt.err (!%p1677_p10)
}
 0x3d8   : > { %1494 = dma.vmem_to_hbm [thread:$0]  (%p1811_p5), %s2046_s16, 128, %s2044_s19, %s1221_s20   ;;  %v1484_v28 = vpop.f32.mrf.mxu1 }
 0x3d9 PF: > { %p1511_p12 = scmp.ge.s32.totalorder %s1723_s27, 2  ;;  %s1246_s17 = sand.u32 1, %s1711_s24  }
 0x3da   : > { %p2103_p8 = scmp.ne.s32.totalorder %s2096_s12, 0  ;;  %s1247_s18 = scalar_lea.sflag [#allocation4], %s1246_s17 }
 0x3dc   : > { %p1504_p11 = pnand %p1511_p12, %p2103_p8 }
 0x3de   : > { %p1505_p0 = pneg %p1504_p11 }
 0x3e0   : > { %1706 = dma.done.wait (%p1505_p0), %s1247_s18, 128  }
 0x3e1   : > { %1708 = vsyncadd (%p1505_p0), %s1247_s18, 4294967168  ;;  %p19_p1 = scmp.ge.s32.totalorder %s1798_s30, 4   ;;  %s2104_s24 = smov %s1715_s25 }
 0x3e2   : > { %s2105_s25 = smov %s1719_s26  ;;  %s2106_s26 = smov %s1809_s10 }
 0x3e3   : > { %s2107_s27 = smov %s1798_s30  ;;  %21 = sbr.rel (!%p19_p1) target bundleno = 5 (0x5), region = 92 }
 0x3e8   :  { %1252 = vsyncpa [#allocation3], 1 }
 0x3e9   :  { %1254 = vsyncpa [#allocation3 + $0x1], 1 }
 0x3ea   :  { %1255 = vsyncpa [#allocation6], 1 }
 0x3eb   :  { %1256 = vsyncpa [#allocation4], 1 }
 0x3ec   :  { %1258 = vsyncpa [#allocation4 + $0x1], 1 }

</bundles_post_ra>
